<compile_context>
chip_gen: v5e
topology: v5e:2x2
jax: 0.10.0
libtpu: 0.0.40
codegen_flags: <defaults>
</compile_context>

<pallas_src>
import functools

import jax
import jax.numpy as jnp
from jax.experimental import pallas as pl
from jax.experimental.pallas import tpu as pltpu

_PAD_SENTINEL = 2 ** 30  # cum_excl value for padded source steps: never matches any j


def _round_up(v: int, m: int) -> int:
    return ((v + m - 1) // m) * m


# ---------------------------------------------------------------------------
# Kernel variant A: single K block (T fits in one VMEM tile) -> direct store,
# no accumulator scratch, 2-D grid (B, L tiles).
# ---------------------------------------------------------------------------
def _lr_kernel_single(blk_lo_ref, blk_hi_ref,   # scalar prefetch (SMEM), (B,)
                      ce_ref, ci_ref, x_ref,    # blocked inputs (VMEM)
                      o_ref):                   # output block (1, TL, H)
    b = pl.program_id(0)
    l = pl.program_id(1)

    TL = o_ref.shape[1]
    TK = x_ref.shape[1]
    tile_lo = l * TL
    tile_hi = tile_lo + TL

    # Does this batch's expanded sequence cover any row of this output tile?
    overlaps = jnp.logical_and(blk_lo_ref[b] < tile_hi, blk_hi_ref[b] > tile_lo)

    @pl.when(overlaps)
    def _compute():
        ce = ce_ref[0]                                            # (1, TK) int32
        ci = ci_ref[0]                                            # (1, TK) int32
        j = jax.lax.broadcasted_iota(jnp.int32, (TL, TK), 0) + tile_lo
        # mask[j, i] = 1 iff source step i covers global output position j.
        mask = jnp.logical_and(j >= ce, j < ci).astype(x_ref.dtype)
        o_ref[0] = jnp.dot(mask, x_ref[0],
                           preferred_element_type=jnp.float32).astype(o_ref.dtype)

    @pl.when(jnp.logical_not(overlaps))
    def _zero():
        o_ref[0] = jnp.zeros_like(o_ref[0])


# ---------------------------------------------------------------------------
# Kernel variant B: multiple K blocks -> block-sparse reduction over K with an
# f32 VMEM accumulator, 3-D grid (B, L tiles, K blocks).
# ---------------------------------------------------------------------------
def _lr_kernel_multi(blk_lo_ref, blk_hi_ref,    # scalar prefetch (SMEM), (B*nk,)
                     ce_ref, ci_ref, x_ref,     # blocked inputs (VMEM)
                     o_ref,                     # output block (1, TL, H)
                     acc_ref):                  # scratch (TL, H) f32
    b = pl.program_id(0)
    l = pl.program_id(1)
    k = pl.program_id(2)
    nk = pl.num_programs(2)

    TL = o_ref.shape[1]
    TK = x_ref.shape[1]
    tile_lo = l * TL
    tile_hi = tile_lo + TL

    @pl.when(k == 0)
    def _init():
        acc_ref[...] = jnp.zeros_like(acc_ref)

    # Block-sparse K: this source block contributes only if its covered output
    # range [min cum_excl, max cum_incl) overlaps the current L tile.
    idx = b * nk + k
    overlaps = jnp.logical_and(blk_lo_ref[idx] < tile_hi,
                               blk_hi_ref[idx] > tile_lo)

    @pl.when(overlaps)
    def _compute():
        ce = ce_ref[0]                                            # (1, TK) int32
        ci = ci_ref[0]                                            # (1, TK) int32
        j = jax.lax.broadcasted_iota(jnp.int32, (TL, TK), 0) + tile_lo
        mask = jnp.logical_and(j >= ce, j < ci).astype(x_ref.dtype)
        acc_ref[...] += jnp.dot(mask, x_ref[0],
                                preferred_element_type=jnp.float32)

    @pl.when(k == nk - 1)
    def _store():
        o_ref[0] = acc_ref[...].astype(o_ref.dtype)


def _pick_tl(max_len: int, H: int, out_itemsize: int) -> int:
    """Largest 128-multiple output tile (<= 512) with a modest VMEM footprint."""
    for tl in (512, 256, 128):
        # double-buffered output block + f32 accumulator
        footprint = tl * H * (2 * out_itemsize + 4)
        if footprint <= 8 * 1024 * 1024:
            return min(tl, _round_up(max_len, 128))
    return min(128, _round_up(max_len, 128))


@functools.partial(jax.jit, static_argnames=("alpha", "max_len"))
def _length_regulator_impl(x, durations, *, alpha, max_len):
    B, T, H = x.shape

    # Duration rounding / clamping / cumulative sums (cheap VPU work, stays in jit).
    dur = jnp.round(alpha * durations.astype(jnp.float32)).astype(jnp.int32)
    dur = jnp.maximum(dur, 0)
    cum_incl = jnp.cumsum(dur, axis=1).astype(jnp.int32)          # (B, T)
    cum_excl = cum_incl - dur                                     # (B, T)

    # --- static tiling decisions (from static shapes / static max_len) ---
    itemsize = jnp.dtype(x.dtype).itemsize
    TL = _pick_tl(max_len, H, itemsize)           # output-tile rows, 128-aligned
    L_pad = _round_up(max_len, TL)                # padded expanded length

    T8 = _round_up(T, 8)
    if T8 > 512:
        TK = 256                                  # K blocks (multiple of 128)
        T_pad = _round_up(T, TK)
    else:
        TK = T8                                   # single K block
        T_pad = T8
    nk = T_pad // TK

    pad_t = T_pad - T
    if pad_t:
        x_p = jnp.pad(x, ((0, 0), (0, pad_t), (0, 0)))
        # Padded steps: cum_excl = +sentinel, cum_incl = 0 -> never cover any j
        # and never inflate a block's [lo, hi) coverage summary.
        cum_excl = jnp.pad(cum_excl, ((0, 0), (0, pad_t)),
                           constant_values=_PAD_SENTINEL)
        cum_incl = jnp.pad(cum_incl, ((0, 0), (0, pad_t)),
                           constant_values=0)
    else:
        x_p = x

    # Per-(batch, K-block) coverage summaries for the scalar-prefetch skip test.
    # Flattened to 1-D to keep the SMEM footprint tight.
    blk_lo = cum_excl.reshape(B, nk, TK).min(axis=2).reshape(-1)  # (B*nk,) int32
    blk_hi = cum_incl.reshape(B, nk, TK).max(axis=2).reshape(-1)  # (B*nk,) int32

    ce3 = cum_excl[:, None, :]                                    # (B, 1, T_pad)
    ci3 = cum_incl[:, None, :]

    cost = pl.CostEstimate(
        flops=int(2 * B * L_pad * T_pad * H),
        transcendentals=0,
        bytes_accessed=int(B * T_pad * H * itemsize            # x
                           + B * L_pad * H * itemsize          # out
                           + 2 * B * T_pad * 4),                # cum arrays
    )

    if nk == 1:
        grid = (B, L_pad // TL)
        grid_spec = pltpu.PrefetchScalarGridSpec(
            num_scalar_prefetch=2,
            grid=grid,
            in_specs=[
                pl.BlockSpec((1, 1, TK), lambda b, l, lo, hi: (b, 0, 0)),   # cum_excl
                pl.BlockSpec((1, 1, TK), lambda b, l, lo, hi: (b, 0, 0)),   # cum_incl
                pl.BlockSpec((1, TK, H), lambda b, l, lo, hi: (b, 0, 0)),   # x
            ],
            out_specs=pl.BlockSpec((1, TL, H), lambda b, l, lo, hi: (b, l, 0)),
            scratch_shapes=[],
        )
        kernel = _lr_kernel_single
        dim_sem = ("parallel", "parallel")
    else:
        grid = (B, L_pad // TL, nk)
        grid_spec = pltpu.PrefetchScalarGridSpec(
            num_scalar_prefetch=2,
            grid=grid,
            in_specs=[
                pl.BlockSpec((1, 1, TK), lambda b, l, k, lo, hi: (b, 0, k)),  # cum_excl
                pl.BlockSpec((1, 1, TK), lambda b, l, k, lo, hi: (b, 0, k)),  # cum_incl
                pl.BlockSpec((1, TK, H), lambda b, l, k, lo, hi: (b, k, 0)),  # x
            ],
            out_specs=pl.BlockSpec((1, TL, H), lambda b, l, k, lo, hi: (b, l, 0)),
            scratch_shapes=[pltpu.VMEM((TL, H), jnp.float32)],
        )
        kernel = _lr_kernel_multi
        dim_sem = ("parallel", "parallel", "arbitrary")

    out_padded = pl.pallas_call(
        kernel,
        out_shape=jax.ShapeDtypeStruct((B, L_pad, H), x.dtype),
        grid_spec=grid_spec,
        compiler_params=pltpu.CompilerParams(
            dimension_semantics=dim_sem,
            vmem_limit_bytes=32 * 1024 * 1024,
        ),
        cost_estimate=cost,
    )(blk_lo, blk_hi, ce3, ci3, x_p)

    # Trim tile padding back to the true expanded length (static, stays in jit).
    return out_padded[:, :max_len, :]


def length_regulator(x: jax.Array, durations: jax.Array,
                     alpha: float = 1.0, max_len: int | None = None) -> jax.Array:
    """JAX/Pallas equivalent of LengthRegulator.forward.

    x: (B, T, H), durations: (B, T) integer.
    Pass `max_len` (max over batch of sum(round(alpha*dur))) as a static int to
    keep the whole op inside jit with no host sync; if None, one host sync is
    done here to recover the exact PyTorch (data-dependent shape) behaviour.
    """
    if max_len is None:
        dur = jnp.maximum(
            jnp.round(alpha * durations.astype(jnp.float32)), 0).astype(jnp.int32)
        max_len = int(jax.device_get(jnp.max(jnp.sum(dur, axis=1))))

    # PyTorch semantics: if the expanded length is 0, return the input unchanged.
    if max_len == 0:
        return x

    return _length_regulator_impl(x, durations,
                                  alpha=float(alpha), max_len=int(max_len))


def _reference_length_regulator(x, durations, alpha=1.0):
    """Pure-numpy reference mirroring the PyTorch semantics."""
    import numpy as np
    x = np.asarray(x)
    dur = np.round(alpha * np.asarray(durations).astype(np.float64)).astype(np.int64)
    dur[dur < 0] = 0
    seqs = [np.repeat(xb, db, axis=0) for xb, db in zip(x, dur)]
    max_len = max(s.shape[0] for s in seqs)
    if max_len == 0:
        return x
    out = np.zeros((x.shape[0], max_len, x.shape[2]), dtype=x.dtype)
    for b, s in enumerate(seqs):
        out[b, : s.shape[0]] = s
    return out


if __name__ == "__main__":
    import numpy as np

    B, T, H = 2, 8, 32
    key = jax.random.PRNGKey(0)
    kx, kd = jax.random.split(key)

    x = jax.random.normal(kx, (B, T, H), dtype=jnp.float32)
    durations = jax.random.randint(kd, (B, T), minval=0, maxval=5, dtype=jnp.int32)

    x_np = np.asarray(x)
    d_np = np.asarray(durations)

    for alpha in (1.0, 1.5):
        # Static output length computed once by the caller/harness (no sync in the
        # jitted path).
        dur_np = np.round(alpha * d_np.astype(np.float64)).astype(np.int64)
        dur_np[dur_np < 0] = 0
        max_len = int(dur_np.sum(axis=1).max())

        out = length_regulator(x, durations, alpha=alpha, max_len=max_len)
        out = jax.block_until_ready(out)

        ref = _reference_length_regulator(x_np, d_np, alpha=alpha)
        np.testing.assert_allclose(np.asarray(out), ref, rtol=1e-5, atol=1e-5)

    print("KERNEL_OK")
</pallas_src>

<mosaic_0001>
module attributes {stable_mosaic.version = 11 : i64} {
  func.func @_lr_kernel_single(%arg0: i32, %arg1: i32, %arg2: memref<2xi32, #tpu.memory_space<smem>>, %arg3: memref<2xi32, #tpu.memory_space<smem>>, %arg4: memref<1x1x8xi32, #tpu.memory_space<vmem>>, %arg5: memref<1x1x8xi32, #tpu.memory_space<vmem>>, %arg6: memref<1x8x32xf32, #tpu.memory_space<vmem>>, %arg7: memref<1x128x32xf32, #tpu.memory_space<vmem>>) attributes {dimension_semantics = [#tpu.dimension_semantics<parallel>, #tpu.dimension_semantics<parallel>], iteration_bounds = array<i64: 2, 1>, scalar_prefetch = 2 : i64, scratch_operands = 0 : i64, tpu.core_type = #tpu.core_type<tc>, window_params = [{transform_indices = @transform_0, window_bounds = array<i64: 1, 1, 8>}, {transform_indices = @transform_1, window_bounds = array<i64: 1, 1, 8>}, {transform_indices = @transform_2, window_bounds = array<i64: 1, 8, 32>}, {transform_indices = @transform_3, window_bounds = array<i64: 1, 128, 32>}]} {
    %c128_i32 = arith.constant 128 : i32
    %0 = arith.muli %arg1, %c128_i32 : i32
    %c128_i32_0 = arith.constant 128 : i32
    %1 = arith.addi %0, %c128_i32_0 : i32
    %2 = arith.index_cast %arg0 : i32 to index
    %3 = memref.load %arg2[%2] : memref<2xi32, #tpu.memory_space<smem>>
    %4 = arith.cmpi slt, %3, %1 : i32
    %5 = arith.index_cast %arg0 : i32 to index
    %6 = memref.load %arg3[%5] : memref<2xi32, #tpu.memory_space<smem>>
    %7 = arith.cmpi sgt, %6, %0 : i32
    %8 = arith.andi %4, %7 : i1
    %9 = arith.extui %8 : i1 to i32
    %c0_i32 = arith.constant 0 : i32
    %10 = arith.cmpi ne, %9, %c0_i32 : i32
    scf.if %10 {
      %c0 = arith.constant 0 : index
      %c0_2 = arith.constant 0 : index
      %c0_3 = arith.constant 0 : index
      %14 = vector.load %arg4[%c0, %c0_2, %c0_3] : memref<1x1x8xi32, #tpu.memory_space<vmem>>, vector<1x1x8xi32>
      %15 = vector.shape_cast %14 : vector<1x1x8xi32> to vector<1x8xi32>
      %c0_4 = arith.constant 0 : index
      %c0_5 = arith.constant 0 : index
      %c0_6 = arith.constant 0 : index
      %16 = vector.load %arg5[%c0_4, %c0_5, %c0_6] : memref<1x1x8xi32, #tpu.memory_space<vmem>>, vector<1x1x8xi32>
      %17 = vector.shape_cast %16 : vector<1x1x8xi32> to vector<1x8xi32>
      %18 = tpu.iota {dimensions = array<i32: 0>} : vector<128x8xi32>
      %19 = vector.broadcast %0 : i32 to vector<128x8xi32>
      %20 = arith.addi %18, %19 : vector<128x8xi32>
      %21 = vector.broadcast %15 : vector<1x8xi32> to vector<128x8xi32>
      %22 = arith.cmpi sge, %20, %21 : vector<128x8xi32>
      %23 = vector.broadcast %17 : vector<1x8xi32> to vector<128x8xi32>
      %24 = arith.cmpi slt, %20, %23 : vector<128x8xi32>
      %25 = arith.andi %22, %24 : vector<128x8xi1>
      %26 = arith.extui %25 : vector<128x8xi1> to vector<128x8xi32>
      %27 = arith.sitofp %26 : vector<128x8xi32> to vector<128x8xf32>
      %c0_7 = arith.constant 0 : index
      %c0_8 = arith.constant 0 : index
      %c0_9 = arith.constant 0 : index
      %28 = vector.load %arg6[%c0_7, %c0_8, %c0_9] : memref<1x8x32xf32, #tpu.memory_space<vmem>>, vector<1x8x32xf32>
      %29 = vector.shape_cast %28 : vector<1x8x32xf32> to vector<8x32xf32>
      %cst = arith.constant dense<0.000000e+00> : vector<128x32xf32>
      %30 = tpu.matmul %27, %29, %cst {dimension_numbers = #tpu.dot_dimension_numbers<[1], [0], [0], [1], [0, 0, 1, 1], [], []>} : vector<128x8xf32>, vector<8x32xf32>, vector<128x32xf32> -> vector<128x32xf32>
      %c0_10 = arith.constant 0 : index
      %c0_11 = arith.constant 0 : index
      %c0_12 = arith.constant 0 : index
      %31 = vector.load %arg7[%c0_10, %c0_11, %c0_12] : memref<1x128x32xf32, #tpu.memory_space<vmem>>, vector<1x128x32xf32>
      %32 = vector.shape_cast %31 : vector<1x128x32xf32> to vector<128x32xf32>
      %33 = vector.shape_cast %30 : vector<128x32xf32> to vector<1x128x32xf32>
      tpu.vector_store %arg7[%c0_10, %c0_11, %c0_12], %33 {strides = array<i32>} : memref<1x128x32xf32, #tpu.memory_space<vmem>>, vector<1x128x32xf32>,
    } else {
    }
    %true = arith.constant true
    %11 = arith.xori %8, %true : i1
    %12 = arith.extui %11 : i1 to i32
    %c0_i32_1 = arith.constant 0 : i32
    %13 = arith.cmpi ne, %12, %c0_i32_1 : i32
    scf.if %13 {
      %cst = arith.constant 0.000000e+00 : f32
      %14 = vector.broadcast %cst : f32 to vector<128x32xf32>
      %c0 = arith.constant 0 : index
      %c0_2 = arith.constant 0 : index
      %c0_3 = arith.constant 0 : index
      %15 = vector.load %arg7[%c0, %c0_2, %c0_3] : memref<1x128x32xf32, #tpu.memory_space<vmem>>, vector<1x128x32xf32>
      %16 = vector.shape_cast %15 : vector<1x128x32xf32> to vector<128x32xf32>
      %17 = vector.shape_cast %14 : vector<128x32xf32> to vector<1x128x32xf32>
      tpu.vector_store %arg7[%c0, %c0_2, %c0_3], %17 {strides = array<i32>} : memref<1x128x32xf32, #tpu.memory_space<vmem>>, vector<1x128x32xf32>,
    } else {
    }
    return
  }
  func.func @transform_0(%arg0: i32, %arg1: i32, %arg2: memref<2xi32, #tpu.memory_space<smem>>, %arg3: memref<2xi32, #tpu.memory_space<smem>>) -> (i32, i32, i32) {
    %c0_i32 = arith.constant 0 : i32
    %c0_i32_0 = arith.constant 0 : i32
    %c0_i32_1 = arith.constant 0 : i32
    return %arg0, %c0_i32, %c0_i32_0 : i32, i32, i32
  }
  func.func @transform_1(%arg0: i32, %arg1: i32, %arg2: memref<2xi32, #tpu.memory_space<smem>>, %arg3: memref<2xi32, #tpu.memory_space<smem>>) -> (i32, i32, i32) {
    %c0_i32 = arith.constant 0 : i32
    %c0_i32_0 = arith.constant 0 : i32
    %c0_i32_1 = arith.constant 0 : i32
    return %arg0, %c0_i32, %c0_i32_0 : i32, i32, i32
  }
  func.func @transform_2(%arg0: i32, %arg1: i32, %arg2: memref<2xi32, #tpu.memory_space<smem>>, %arg3: memref<2xi32, #tpu.memory_space<smem>>) -> (i32, i32, i32) {
    %c0_i32 = arith.constant 0 : i32
    %c0_i32_0 = arith.constant 0 : i32
    %c0_i32_1 = arith.constant 0 : i32
    return %arg0, %c0_i32, %c0_i32_0 : i32, i32, i32
  }
  func.func @transform_3(%arg0: i32, %arg1: i32, %arg2: memref<2xi32, #tpu.memory_space<smem>>, %arg3: memref<2xi32, #tpu.memory_space<smem>>) -> (i32, i32, i32) {
    %c0_i32 = arith.constant 0 : i32
    %c0_i32_0 = arith.constant 0 : i32
    return %arg0, %arg1, %c0_i32 : i32, i32, i32
  }
}

</mosaic_0001>

<bundles_post_ra>
// kernel: _length_regulator_impl.1
= control target key start
LH: loop header
LB: loop body
LE: loop exit
PB: predicated region body
PF: predicated region fallthrough
CT: control target
= control target key end

     0   :  { %s739_s24 = smov [#allocation3]   ;;  %s740_s25 = smov [#allocation4]   ;;  %s981_s0 = inlined_call_operand.vmem [shape: s32[2], index: 0, kind: input, shape index: {}]   ;;  %s982_s2 = inlined_call_operand.vmem [shape: s32[2,1,8], index: 2, kind: input, shape index: {}]   ;;  %s983_s3 = inlined_call_operand.vmem [shape: s32[2,1,8], index: 3, kind: input, shape index: {}]   ;;  %s984_s4 = inlined_call_operand.vmem [shape: f32[2,8,32], index: 4, kind: input, shape index: {}]   ;;  %s985_s5 = inlined_call_operand.vmem [shape: f32[2,128,32], index: 5, kind: output, shape index: {}]   ;;  %s986_s1 = inlined_call_operand.vmem [shape: s32[2], index: 1, kind: input, shape index: {}]  }
   0x1   :  { %s11_s20 = sshll.u32 %s981_s0, 4  ;;  %s16_s23 = sshll.u32 %s986_s1, 4  ;;  %s12_s20 = int_to_ptr.vmem [resolvable:$true] %s11_s20  ;;  %s17_s23 = int_to_ptr.vmem [resolvable:$true] %s16_s23 }
   0x2   :  { %14 = dma.vmem_to_smem %s12_s20, 16, %s739_s24, [#allocation2] }
   0x3   :  { %19 = dma.vmem_to_smem %s17_s23, 16, %s740_s25, [#allocation2] }
   0x4   :  { %725 = dma.done.wait [#allocation2], 32 }
   0x5   :  { %726 = vsyncadd [#allocation2], 4294967264 }
   0x6   :  { %22 = sfence }
   0x7   :  { %s779_s26 = smov 0   ;;  %s781_s27 = smov 0  }
   0x8   :  { %s783_s28 = smov 0  }
   0x9 LB: > { %s40_s0 = sadd.s32 1, %s733_s27  ;;  %p617_p0 = scmp.ge.s32.totalorder %s737_s28, 1  ;;  %s737_s28 = sphi %s783_s28, %s28_s28   ;;  %s733_s27 = sphi %s781_s27, %s989_s27   ;;  %s729_s26 = sphi %s779_s26, %s988_s26  }
   0xa   : > { %p42_p1 = scmp.ge.s32.totalorder %s40_s0, 2  ;;  %p181_p2 = scmp.lt.s32.totalorder %s737_s28, 3 }
   0xc   : > { %s991_s0 = smov (%p42_p1, %s40_s0), 0  ;;  %p182_p3 = pnand %p617_p0, %p181_p2 }
   0xd   : > { %p214_p4 = scmp.lt.s32.totalorder (!%p182_p3), %s729_s26, 1  ;;  %s236_s1 = sld [smem:[#allocation3 + %s729_s26]] (!%p182_p3) }
   0xe   : > { %185 = sbr.rel (%p182_p3) target bundleno = 216 (0xd8), region = 32  ;;  %s238_s29 = sld [smem:[#allocation4 + %s729_s26]] (!%p182_p3) }
  0x13   : > { %s993_s26 = smov (!%p214_p4, %s729_s26), 1  ;;  %p237_p5 = scmp.lt.s32.totalorder %s236_s1, 128 }
  0x14   : > { %s216_s7 = scalar_lea.vmem %s982_s2, %s993_s26  ;;  %s219_s10 = scalar_lea.vmem %s983_s3, %s993_s26 }
  0x15   : > { %s618_s11 = sshll.u32 %s993_s26, 3  ;;  %s655_s12 = sshll.u32 %s993_s26, 7 }
  0x16   : > { %s223_s15 = scalar_lea.vmem %s984_s4, %s618_s11  ;;  %s809_s18 = scalar_lea.vmem %s985_s5, %s655_s12 }
  0x17   : > { %p239_p6 = scmp.gt.s32.totalorder %s238_s29, 0 }
  0x19   : > { %p811_p7 = pnand %p239_p6, %p237_p5 }
  0x1b   : > { %243 = sbr.rel (%p811_p7) target bundleno = 199 (0xc7), region = 36 }
  0x20   : > { %v362_v0 = vld [vmem:[%s223_s15] sm:$0xff]  ;;  %v246_v1 = vlaneseq  ;;  %vm363_vm0 = vcmask 64512   ;;  %v741_v11 = vmov 0.0  }
  0x21   : > { %657 = vmatpush.msra.mxu2 %v362_v0  ;;  %658 = vmatpush.msra.mxu3 %v362_v0  ;;  %v819_v3 = vld [vmem:[%s216_s7] ss:$0 sm:$0xff] }
  0x22   : > { %v817_v2 = vshrl.u32 %v246_v1, 7  ;;  %v821_v4 = vld [vmem:[%s219_s10] ss:$0 sm:$0xff]  ;;  %427 = vmatpush.msra.mxu0 %v362_v0  ;;  %656 = vmatpush.msra.mxu1 %v362_v0 }
  0x24   : > { %v255_v5 = vadd.s32 64, %v817_v2  ;;  %v259_v6 = vadd.s32 96, %v817_v2  ;;  %vm281_vm1 = vcmp.ge.s32.totalorder %v817_v2, %v819_v3  ;;  %vm298_vm2 = vcmp.lt.s32.totalorder %v817_v2, %v821_v4 }
  0x25   : > { %vm314_vm3 = vmand %vm281_vm1, %vm298_vm2  ;;  %v251_v7 = vadd.s32 32, %v817_v2  ;;  %v256_v8 = vadd.s32 72, %v817_v2  ;;  %v260_v9 = vadd.s32 104, %v817_v2  ;;  %v248_v10 = vadd.s32 8, %v817_v2 }
  0x26   : > { %vm289_vm4 = vcmp.ge.s32.totalorder %v255_v5, %v819_v3  ;;  %vm306_vm5 = vcmp.lt.s32.totalorder %v255_v5, %v821_v4  ;;  %vm293_vm6 = vcmp.ge.s32.totalorder %v259_v6, %v819_v3  ;;  %vm310_vm7 = vcmp.lt.s32.totalorder %v259_v6, %v821_v4 }
  0x27   : > { %vm322_vm8 = vmand %vm289_vm4, %vm306_vm5  ;;  %v621_v12 = vsel %vm314_vm3, 1.0, %v741_v11  ;;  %vm285_vm9 = vcmp.ge.s32.totalorder %v251_v7, %v819_v3  ;;  %vm302_vm10 = vcmp.lt.s32.totalorder %v251_v7, %v821_v4  ;;  %vm290_vm11 = vcmp.ge.s32.totalorder %v256_v8, %v819_v3 }
  0x28   : > { %v629_v13 = vsel %vm322_vm8, 1.0, %v741_v11  ;;  %vm326_vm12 = vmand %vm293_vm6, %vm310_vm7  ;;  %637 = vmatmul.msk.f32.vlgmr.msra.gmra.mxu0 %vm363_vm0, %v621_v12  ;;  %vm307_vm13 = vcmp.lt.s32.totalorder %v256_v8, %v821_v4  ;;  %vm294_vm14 = vcmp.ge.s32.totalorder %v260_v9, %v819_v3  ;;  %vm311_vm15 = vcmp.lt.s32.totalorder %v260_v9, %v821_v4 }
  0x29   : > { %645 = vmatmul.msk.f32.vlgmr.msra.gmra.mxu2 %vm363_vm0, %v629_v13  ;;  %v633_v14 = vsel %vm326_vm12, 1.0, %v741_v11  ;;  %vm318_vm1 = vmand %vm285_vm9, %vm302_vm10  ;;  %vm282_vm2 = vcmp.ge.s32.totalorder %v248_v10, %v819_v3  ;;  %vm299_vm3 = vcmp.lt.s32.totalorder %v248_v10, %v821_v4  ;;  %v252_v15 = vadd.s32 40, %v817_v2 }
  0x2a   : > { %649 = vmatmul.msk.f32.vlgmr.msra.gmra.mxu3 %vm363_vm0, %v633_v14  ;;  %v625_v16 = vsel %vm318_vm1, 1.0, %v741_v11  ;;  %vm323_vm4 = vmand %vm290_vm11, %vm307_vm13  ;;  %v249_v17 = vadd.s32 16, %v817_v2  ;;  %v257_v18 = vadd.s32 80, %v817_v2  ;;  %v261_v20 = vadd.s32 112, %v817_v2 }
  0x2b   : > { %641 = vmatmul.msk.f32.vlgmr.msra.gmra.mxu1 %vm363_vm0, %v625_v16  ;;  %vm327_vm5 = vmand %vm294_vm14, %vm311_vm15  ;;  %vm286_vm6 = vcmp.ge.s32.totalorder %v252_v15, %v819_v3  ;;  %vm303_vm7 = vcmp.lt.s32.totalorder %v252_v15, %v821_v4  ;;  %v630_v21 = vsel %vm323_vm4, 1.0, %v741_v11  ;;  %v253_v22 = vadd.s32 48, %v817_v2 }
  0x2c   : > { %vm315_vm8 = vmand %vm282_vm2, %vm299_vm3  ;;  %v634_v23 = vsel %vm327_vm5, 1.0, %v741_v11  ;;  %vm283_vm10 = vcmp.ge.s32.totalorder %v249_v17, %v819_v3  ;;  %vm300_vm11 = vcmp.lt.s32.totalorder %v249_v17, %v821_v4  ;;  %vm291_vm12 = vcmp.ge.s32.totalorder %v257_v18, %v819_v3 }
  0x2d   : > { %v622_v19 = vsel %vm315_vm8, 1.0, %v741_v11  ;;  %vm319_vm9 = vmand %vm286_vm6, %vm303_vm7  ;;  %vm308_vm13 = vcmp.lt.s32.totalorder %v257_v18, %v821_v4  ;;  %vm295_vm14 = vcmp.ge.s32.totalorder %v261_v20, %v819_v3  ;;  %vm312_vm15 = vcmp.lt.s32.totalorder %v261_v20, %v821_v4 }
  0x2e   : > { %v626_v24 = vsel %vm319_vm9, 1.0, %v741_v11  ;;  %vm316_vm1 = vmand %vm283_vm10, %vm300_vm11  ;;  %vm287_vm2 = vcmp.ge.s32.totalorder %v253_v22, %v819_v3  ;;  %vm304_vm3 = vcmp.lt.s32.totalorder %v253_v22, %v821_v4  ;;  %v250_v25 = vadd.s32 24, %v817_v2 }
  0x2f   : > { %vm324_vm4 = vmand %vm291_vm12, %vm308_vm13  ;;  %v258_v26 = vadd.s32 88, %v817_v2  ;;  %v623_v27 = vsel %vm316_vm1, 1.0, %v741_v11  ;;  %v262_v28 = vadd.s32 120, %v817_v2  ;;  %v254_v30 = vadd.s32 56, %v817_v2 }
  0x30   : > { %638 = vmatmul.msk.f32.gmra.mxu0 %vm363_vm0, %v622_v19  ;;  %vm328_vm5 = vmand %vm295_vm14, %vm312_vm15  ;;  %v631_v29 = vsel %vm324_vm4, 1.0, %v741_v11  ;;  %vm284_vm7 = vcmp.ge.s32.totalorder %v250_v25, %v819_v3  ;;  %vm301_vm8 = vcmp.lt.s32.totalorder %v250_v25, %v821_v4  ;;  %vm477_vm4 = vcmask 261120  }
  0x31   : > { %646 = vmatmul.msk.f32.gmra.mxu2 %vm363_vm0, %v630_v21  ;;  %vm320_vm6 = vmand %vm287_vm2, %vm304_vm3  ;;  %v635_v31 = vsel %vm328_vm5, 1.0, %v741_v11  ;;  %vm292_vm9 = vcmp.ge.s32.totalorder %v258_v26, %v819_v3  ;;  %vm309_vm10 = vcmp.lt.s32.totalorder %v258_v26, %v821_v4  ;;  %vm296_vm11 = vcmp.ge.s32.totalorder %v262_v28, %v819_v3 }
  0x32   : > { %650 = vmatmul.msk.f32.gmra.mxu3 %vm363_vm0, %v634_v23  ;;  %v627_v32 = vsel %vm320_vm6, 1.0, %v741_v11  ;;  %vm313_vm12 = vcmp.lt.s32.totalorder %v262_v28, %v821_v4  ;;  %vm317_vm13 = vmand %vm284_vm7, %vm301_vm8  ;;  %vm288_vm14 = vcmp.ge.s32.totalorder %v254_v30, %v819_v3  ;;  %vm305_vm15 = vcmp.lt.s32.totalorder %v254_v30, %v821_v4 }
  0x33   : > { %642 = vmatmul.msk.f32.gmra.mxu1 %vm363_vm0, %v626_v24  ;;  %vm325_vm1 = vmand %vm292_vm9, %vm309_vm10  ;;  %v624_v33 = vsel %vm317_vm13, 1.0, %v741_v11 }
  0x34   : > { %vm329_vm2 = vmand %vm296_vm11, %vm313_vm12  ;;  %v632_v34 = vsel %vm325_vm1, 1.0, %v741_v11 }
  0x35   : > { %vm321_vm3 = vmand %vm288_vm14, %vm305_vm15  ;;  %v636_v35 = vsel %vm329_vm2, 1.0, %v741_v11 }
  0x36   : > { %v628_v36 = vsel %vm321_vm3, 1.0, %v741_v11 }
  0x38   : > { %639 = vmatmul.msk.f32.gmra.mxu0 %vm363_vm0, %v623_v27 }
  0x39   : > { %647 = vmatmul.msk.f32.gmra.mxu2 %vm363_vm0, %v631_v29 }
  0x3a   : > { %651 = vmatmul.msk.f32.gmra.mxu3 %vm363_vm0, %v635_v31 }
  0x3b   : > { %643 = vmatmul.msk.f32.gmra.mxu1 %vm363_vm0, %v627_v32 }
  0x40   : > { %640 = vmatmul.msk.f32.gmra.mxu0 %vm363_vm0, %v624_v33 }
  0x41   : > { %648 = vmatmul.msk.f32.gmra.mxu2 %vm363_vm0, %v632_v34 }
  0x42   : > { %652 = vmatmul.msk.f32.gmra.mxu3 %vm363_vm0, %v636_v35 }
  0x43   : > { %644 = vmatmul.msk.f32.gmra.mxu1 %vm363_vm0, %v628_v36 }
  0xa5   : > { %v429_v37 = vpop.f32.mrf.mxu0 }
  0xa6   : > { %478 = vst.msk [vmem:[%s809_s18] sm:$0xff] %vm477_vm4, %v429_v37 }
  0xa8   : > { %v441_v38 = vpop.f32.mrf.mxu1 }
  0xa9   : > { %482 = vst.msk [vmem:[%s809_s18 + $0x20] sm:$0xff] %vm477_vm4, %v441_v38 }
  0xac   : > { %v453_v39 = vpop.f32.mrf.mxu2 }
  0xad   : > { %486 = vst.msk [vmem:[%s809_s18 + $0x40] sm:$0xff] %vm477_vm4, %v453_v39  ;;  %v465_v40 = vpop.f32.mrf.mxu3  ;;  %v432_v41 = vpop.f32.mrf.mxu0 }
  0xae   : > { %490 = vst.msk [vmem:[%s809_s18 + $0x60] sm:$0xff] %vm477_vm4, %v465_v40 }
  0xaf   : > { %479 = vst.msk [vmem:[%s809_s18 + $0x8] sm:$0xff] %vm477_vm4, %v432_v41 }
  0xb0   : > { %v444_v42 = vpop.f32.mrf.mxu1 }
  0xb1   : > { %483 = vst.msk [vmem:[%s809_s18 + $0x28] sm:$0xff] %vm477_vm4, %v444_v42 }
  0xb4   : > { %v456_v43 = vpop.f32.mrf.mxu2 }
  0xb5   : > { %487 = vst.msk [vmem:[%s809_s18 + $0x48] sm:$0xff] %vm477_vm4, %v456_v43  ;;  %v468_v44 = vpop.f32.mrf.mxu3  ;;  %v435_v45 = vpop.f32.mrf.mxu0 }
  0xb6   : > { %491 = vst.msk [vmem:[%s809_s18 + $0x68] sm:$0xff] %vm477_vm4, %v468_v44 }
  0xb7   : > { %480 = vst.msk [vmem:[%s809_s18 + $0x10] sm:$0xff] %vm477_vm4, %v435_v45 }
  0xb8   : > { %v447_v46 = vpop.f32.mrf.mxu1 }
  0xb9   : > { %484 = vst.msk [vmem:[%s809_s18 + $0x30] sm:$0xff] %vm477_vm4, %v447_v46 }
  0xbc   : > { %v459_v47 = vpop.f32.mrf.mxu2 }
  0xbd   : > { %488 = vst.msk [vmem:[%s809_s18 + $0x50] sm:$0xff] %vm477_vm4, %v459_v47  ;;  %v471_v48 = vpop.f32.mrf.mxu3  ;;  %v438_v49 = vpop.f32.mrf.mxu0 }
  0xbe   : > { %492 = vst.msk [vmem:[%s809_s18 + $0x70] sm:$0xff] %vm477_vm4, %v471_v48 }
  0xbf   : > { %481 = vst.msk [vmem:[%s809_s18 + $0x18] sm:$0xff] %vm477_vm4, %v438_v49 }
  0xc0   : > { %v450_v50 = vpop.f32.mrf.mxu1 }
  0xc1   : > { %485 = vst.msk [vmem:[%s809_s18 + $0x38] sm:$0xff] %vm477_vm4, %v450_v50 }
  0xc4   : > { %v462_v51 = vpop.f32.mrf.mxu2 }
  0xc5   : > { %489 = vst.msk [vmem:[%s809_s18 + $0x58] sm:$0xff] %vm477_vm4, %v462_v51  ;;  %v474_v52 = vpop.f32.mrf.mxu3 }
  0xc6   : > { %493 = vst.msk [vmem:[%s809_s18 + $0x78] sm:$0xff] %vm477_vm4, %v474_v52 }
  0xc7 PF: > { %496 = sbr.rel (!%p811_p7) target bundleno = 216 (0xd8), region = 40  ;;  %vm497_vm0 = vcmask (%p811_p7), 261120   ;;  %v742_v53 = vmov (%p811_p7), 0.0  }
  0xc8   : > { %498 = vst.msk [vmem:[%s809_s18] sm:$0xff] (%p811_p7), %vm497_vm0, %v742_v53 }
  0xc9   : > { %499 = vst.msk [vmem:[%s809_s18 + $0x8] sm:$0xff] (%p811_p7), %vm497_vm0, %v742_v53 }
  0xca   : > { %500 = vst.msk [vmem:[%s809_s18 + $0x10] sm:$0xff] (%p811_p7), %vm497_vm0, %v742_v53 }
  0xcb   : > { %501 = vst.msk [vmem:[%s809_s18 + $0x18] sm:$0xff] (%p811_p7), %vm497_vm0, %v742_v53 }
  0xcc   : > { %502 = vst.msk [vmem:[%s809_s18 + $0x20] sm:$0xff] %vm497_vm0, %v742_v53 }
  0xcd   : > { %503 = vst.msk [vmem:[%s809_s18 + $0x28] sm:$0xff] %vm497_vm0, %v742_v53 }
  0xce   : > { %504 = vst.msk [vmem:[%s809_s18 + $0x30] sm:$0xff] %vm497_vm0, %v742_v53 }
  0xcf   : > { %505 = vst.msk [vmem:[%s809_s18 + $0x38] sm:$0xff] %vm497_vm0, %v742_v53 }
  0xd0   : > { %506 = vst.msk [vmem:[%s809_s18 + $0x40] sm:$0xff] %vm497_vm0, %v742_v53 }
  0xd1   : > { %507 = vst.msk [vmem:[%s809_s18 + $0x48] sm:$0xff] %vm497_vm0, %v742_v53 }
  0xd2   : > { %508 = vst.msk [vmem:[%s809_s18 + $0x50] sm:$0xff] %vm497_vm0, %v742_v53 }
  0xd3   : > { %509 = vst.msk [vmem:[%s809_s18 + $0x58] sm:$0xff] %vm497_vm0, %v742_v53 }
  0xd4   : > { %510 = vst.msk [vmem:[%s809_s18 + $0x60] sm:$0xff] %vm497_vm0, %v742_v53 }
  0xd5   : > { %511 = vst.msk [vmem:[%s809_s18 + $0x68] sm:$0xff] %vm497_vm0, %v742_v53 }
  0xd6   : > { %512 = vst.msk [vmem:[%s809_s18 + $0x70] sm:$0xff] %vm497_vm0, %v742_v53 }
  0xd7   : > { %513 = vst.msk [vmem:[%s809_s18 + $0x78] sm:$0xff] %vm497_vm0, %v742_v53 }
  0xd8 PF: > { %s28_s28 = sadd.s32 1, %s737_s28   ;;  %s988_s26 = smov %s733_s27 }
  0xd9   : > { %p25_p8 = scmp.ge.s32.totalorder %s28_s28, 4   ;;  %s989_s27 = smov %s991_s0 }
  0xdb   :  { %27 = sbr.rel (!%p25_p8) target bundleno = 9 (0x9), region = 76 }

</bundles_post_ra>
